<compile_context>
chip_gen: v5e
topology: v5e:2x2
jax: 0.10.0
libtpu: 0.0.40
codegen_flags: <defaults>
</compile_context>

<pallas_src>
import jax
import jax.numpy as jnp
from jax import lax
from jax.experimental import pallas as pl
from jax.experimental.pallas import tpu as pltpu


def _round_up(x, m):
    return ((x + m - 1) // m) * m


def _typing_kernel(plen_ref,            # SMEM scalar-prefetch: (Bp,) int32
                   hid_ref,             # VMEM (S, H)   (batch dim squeezed)
                   w1_ref, b1_ref,      # VMEM (H, H), (1, H)
                   w2_ref, b2_ref,      # VMEM (H, Tp), (1, Tp)
                   out_ref,             # VMEM (TB, Tp) — resident across axis 1
                   pooled_ref):         # VMEM scratch (TB, H) f32
    i = pl.program_id(0)
    j = pl.program_id(1)
    tb = pl.num_programs(1)
    seq_len = hid_ref.shape[0]

    # --- PivotEntityPooler: mean of tokens [1 : pivot_len+1] -----------------
    plen = plen_ref[i * tb + j]                                   # int32 scalar
    # Number of tokens actually averaged by the PyTorch slice, clamped >= 1.
    cnt = jnp.maximum(jnp.minimum(plen, seq_len - 1), 1)
    inv = 1.0 / jnp.full((1, 1), cnt, jnp.float32)                # (1, 1) f32

    pos = lax.broadcasted_iota(jnp.int32, (1, seq_len), 1)        # (1, S)
    sel = (pos >= 1) & (pos <= plen)
    mask = jnp.where(sel, inv, 0.0)                               # (1, S), 1/cnt folded in

    pooled_ref[pl.ds(j, 1), :] = jnp.dot(
        mask, hid_ref[...].astype(jnp.float32),
        preferred_element_type=jnp.float32)                       # (1, H)

    # --- BaselineTypingHead: run batched once per TB-row tile ----------------
    @pl.when(j == tb - 1)
    def _():
        x = jnp.tanh(
            jnp.dot(pooled_ref[...], w1_ref[...],
                    preferred_element_type=jnp.float32) + b1_ref[...])   # (TB, H)
        logits = (jnp.dot(x, w2_ref[...],
                          preferred_element_type=jnp.float32)
                  + b2_ref[...])                                         # (TB, Tp)
        out_ref[...] = logits.astype(out_ref.dtype)


def baseline_semantic_typing(sequence_output, pivot_len_list,
                             w1, b1, w2, b2, labels=None, *, block_b=None):
    """sequence_output: [B, S, H] f32, pivot_len_list: [B] int.
    Returns (loss_or_None, logits[B, T])."""
    B, S, H = sequence_output.shape
    T = w2.shape[1]

    if block_b is None:
        block_b = min(128, _round_up(B, 8))      # TB >= 8 rows per head matmul
    Bp = _round_up(B, block_b)
    Tp = _round_up(T, 128)                       # lane-dense output

    seq = sequence_output
    plen = pivot_len_list.astype(jnp.int32)
    if Bp != B:
        seq = jnp.pad(seq, ((0, Bp - B), (0, 0), (0, 0)))
        plen = jnp.pad(plen, (0, Bp - B), constant_values=1)
    w2p = jnp.pad(w2, ((0, 0), (0, Tp - T))) if Tp != T else w2
    b2p = jnp.pad(b2, (0, Tp - T)) if Tp != T else b2

    num_tiles = Bp // block_b

    grid_spec = pltpu.PrefetchScalarGridSpec(
        num_scalar_prefetch=1,
        grid=(num_tiles, block_b),
        in_specs=[
            pl.BlockSpec((pl.Squeezed(), S, H),
                         lambda i, j, plen_ref: (i * block_b + j, 0, 0)),
            pl.BlockSpec((H, H), lambda i, j, plen_ref: (0, 0)),
            pl.BlockSpec((1, H), lambda i, j, plen_ref: (0, 0)),
            pl.BlockSpec((H, Tp), lambda i, j, plen_ref: (0, 0)),
            pl.BlockSpec((1, Tp), lambda i, j, plen_ref: (0, 0)),
        ],
        out_specs=pl.BlockSpec((block_b, Tp), lambda i, j, plen_ref: (i, 0)),
        scratch_shapes=[pltpu.VMEM((block_b, H), jnp.float32)],
    )

    logits_p = pl.pallas_call(
        _typing_kernel,
        grid_spec=grid_spec,
        out_shape=jax.ShapeDtypeStruct((Bp, Tp), jnp.float32),
        compiler_params=pltpu.CompilerParams(
            dimension_semantics=("parallel", "arbitrary")),
    )(plen, seq, w1, b1.reshape(1, H), w2p, b2p.reshape(1, Tp))

    logits = logits_p[:B, :T]

    loss = None
    if labels is not None:
        # CrossEntropyLoss (mean reduction) — glue in plain JAX.
        logp = jax.nn.log_softmax(logits, axis=-1)
        loss = -jnp.mean(jnp.take_along_axis(logp, labels[:, None], axis=-1))
    return loss, logits


def _reference(sequence_output, pivot_len_list, w1, b1, w2, b2):
    B = sequence_output.shape[0]
    pooled = []
    for i in range(B):
        L = int(pivot_len_list[i])
        pooled.append(jnp.mean(sequence_output[i, 1:L + 1], axis=0))
    pooled = jnp.stack(pooled, axis=0)
    x = jnp.tanh(pooled @ w1 + b1)
    return x @ w2 + b2


if __name__ == "__main__":
    B, S, H, T = 2, 8, 32, 10   # batch, seq, hidden_size, num_semantic_types

    key = jax.random.PRNGKey(0)
    k_seq, k_w1, k_b1, k_w2, k_b2, k_lab = jax.random.split(key, 6)

    sequence_output = jax.random.normal(k_seq, (B, S, H), jnp.float32)
    pivot_len_list = jnp.array([5, 3], jnp.int32)

    # Deterministic "nn.Linear"-style parameters (w stored as [in, out]).
    w1 = jax.random.normal(k_w1, (H, H), jnp.float32) * 0.05
    b1 = jax.random.normal(k_b1, (H,), jnp.float32) * 0.05
    w2 = jax.random.normal(k_w2, (H, T), jnp.float32) * 0.05
    b2 = jax.random.normal(k_b2, (T,), jnp.float32) * 0.05
    labels = jax.random.randint(k_lab, (B,), 0, T)

    loss, logits = baseline_semantic_typing(
        sequence_output, pivot_len_list, w1, b1, w2, b2, labels=labels)
    logits = jax.block_until_ready(logits)
    loss = jax.block_until_ready(loss)

    ref = _reference(sequence_output, pivot_len_list, w1, b1, w2, b2)
    assert logits.shape == (B, T)
    assert jnp.allclose(logits, ref, atol=1e-4, rtol=1e-4), "mismatch vs reference"
    assert bool(jnp.isfinite(loss)), "non-finite loss"
    print("KERNEL_OK")
</pallas_src>

<mosaic_0001>
module attributes {stable_mosaic.version = 11 : i64} {
  func.func @_typing_kernel(%arg0: i32, %arg1: i32, %arg2: memref<8xi32, #tpu.memory_space<smem>>, %arg3: memref<1x8x32xf32, #tpu.memory_space<vmem>>, %arg4: memref<32x32xf32, #tpu.memory_space<vmem>>, %arg5: memref<1x32xf32, #tpu.memory_space<vmem>>, %arg6: memref<32x128xf32, #tpu.memory_space<vmem>>, %arg7: memref<1x128xf32, #tpu.memory_space<vmem>>, %arg8: memref<8x128xf32, #tpu.memory_space<vmem>>, %arg9: memref<8x32xf32, #tpu.memory_space<vmem>>) attributes {dimension_semantics = [#tpu.dimension_semantics<parallel>, #tpu.dimension_semantics<arbitrary>], iteration_bounds = array<i64: 1, 8>, scalar_prefetch = 1 : i64, scratch_operands = 1 : i64, tpu.core_type = #tpu.core_type<tc>, window_params = [{transform_indices = @transform_0, window_bounds = array<i64: 1, 8, 32>}, {pipeline_mode = #tpu.pipeline_mode<synchronous>, transform_indices = @transform_1, window_bounds = array<i64: 32, 32>}, {pipeline_mode = #tpu.pipeline_mode<synchronous>, transform_indices = @transform_2, window_bounds = array<i64: 1, 32>}, {pipeline_mode = #tpu.pipeline_mode<synchronous>, transform_indices = @transform_3, window_bounds = array<i64: 32, 128>}, {pipeline_mode = #tpu.pipeline_mode<synchronous>, transform_indices = @transform_4, window_bounds = array<i64: 1, 128>}, {transform_indices = @transform_5, window_bounds = array<i64: 8, 128>}]} {
    %c8_i32 = arith.constant 8 : i32
    %0 = arith.muli %arg0, %c8_i32 : i32
    %1 = arith.addi %0, %arg1 : i32
    %2 = arith.index_cast %1 : i32 to index
    %3 = memref.load %arg2[%2] : memref<8xi32, #tpu.memory_space<smem>>
    %c7_i32 = arith.constant 7 : i32
    %4 = arith.minsi %3, %c7_i32 : i32
    %c1_i32 = arith.constant 1 : i32
    %5 = arith.maxsi %4, %c1_i32 : i32
    %6 = arith.sitofp %5 : i32 to f32
    %7 = vector.broadcast %6 : f32 to vector<1x1xf32>
    %cst = arith.constant 1.000000e+00 : f32
    %8 = vector.broadcast %cst : f32 to vector<1x1xf32>
    %9 = arith.divf %8, %7 : vector<1x1xf32>
    %10 = tpu.iota {dimensions = array<i32: 1>} : vector<1x8xi32>
    %c1_i32_0 = arith.constant 1 : i32
    %11 = vector.broadcast %c1_i32_0 : i32 to vector<1x8xi32>
    %12 = arith.cmpi sge, %10, %11 : vector<1x8xi32>
    %13 = vector.broadcast %3 : i32 to vector<1x8xi32>
    %14 = arith.cmpi sle, %10, %13 : vector<1x8xi32>
    %15 = arith.andi %12, %14 : vector<1x8xi1>
    %cst_1 = arith.constant 0.000000e+00 : f32
    %16 = vector.shape_cast %9 : vector<1x1xf32> to vector<1x1xf32>
    %17 = vector.broadcast %16 : vector<1x1xf32> to vector<1x8xf32>
    %18 = vector.broadcast %cst_1 : f32 to vector<1x8xf32>
    %19 = arith.select %15, %17, %18 : vector<1x8xi1>, vector<1x8xf32>
    %c0 = arith.constant 0 : index
    %c0_2 = arith.constant 0 : index
    %c0_3 = arith.constant 0 : index
    %20 = vector.load %arg3[%c0, %c0_2, %c0_3] : memref<1x8x32xf32, #tpu.memory_space<vmem>>, vector<1x8x32xf32>
    %21 = vector.shape_cast %20 : vector<1x8x32xf32> to vector<8x32xf32>
    %cst_4 = arith.constant dense<0.000000e+00> : vector<1x32xf32>
    %22 = tpu.matmul %19, %21, %cst_4 {dimension_numbers = #tpu.dot_dimension_numbers<[1], [0], [0], [1], [0, 0, 1, 1], [], []>} : vector<1x8xf32>, vector<8x32xf32>, vector<1x32xf32> -> vector<1x32xf32>
    %23 = arith.index_cast %arg1 : i32 to index
    %c0_5 = arith.constant 0 : index
    %24 = vector.load %arg9[%23, %c0_5] : memref<8x32xf32, #tpu.memory_space<vmem>>, vector<1x32xf32>
    tpu.vector_store %arg9[%23, %c0_5], %22 {strides = array<i32>} : memref<8x32xf32, #tpu.memory_space<vmem>>, vector<1x32xf32>,
    %c7_i32_6 = arith.constant 7 : i32
    %25 = arith.cmpi eq, %arg1, %c7_i32_6 : i32
    %26 = arith.extui %25 : i1 to i32
    %c0_i32 = arith.constant 0 : i32
    %27 = arith.cmpi ne, %26, %c0_i32 : i32
    scf.if %27 {
      %c0_7 = arith.constant 0 : index
      %c0_8 = arith.constant 0 : index
      %28 = vector.load %arg9[%c0_7, %c0_8] : memref<8x32xf32, #tpu.memory_space<vmem>>, vector<8x32xf32>
      %c0_9 = arith.constant 0 : index
      %c0_10 = arith.constant 0 : index
      %29 = vector.load %arg4[%c0_9, %c0_10] : memref<32x32xf32, #tpu.memory_space<vmem>>, vector<32x32xf32>
      %cst_11 = arith.constant dense<0.000000e+00> : vector<8x32xf32>
      %30 = tpu.matmul %28, %29, %cst_11 {dimension_numbers = #tpu.dot_dimension_numbers<[1], [0], [0], [1], [0, 0, 1, 1], [], []>} : vector<8x32xf32>, vector<32x32xf32>, vector<8x32xf32> -> vector<8x32xf32>
      %c0_12 = arith.constant 0 : index
      %c0_13 = arith.constant 0 : index
      %31 = vector.load %arg5[%c0_12, %c0_13] : memref<1x32xf32, #tpu.memory_space<vmem>>, vector<1x32xf32>
      %32 = vector.broadcast %31 : vector<1x32xf32> to vector<8x32xf32>
      %33 = arith.addf %30, %32 : vector<8x32xf32>
      %34 = math.tanh %33 : vector<8x32xf32>
      %c0_14 = arith.constant 0 : index
      %c0_15 = arith.constant 0 : index
      %35 = vector.load %arg6[%c0_14, %c0_15] : memref<32x128xf32, #tpu.memory_space<vmem>>, vector<32x128xf32>
      %cst_16 = arith.constant dense<0.000000e+00> : vector<8x128xf32>
      %36 = tpu.matmul %34, %35, %cst_16 {dimension_numbers = #tpu.dot_dimension_numbers<[1], [0], [0], [1], [0, 0, 1, 1], [], []>} : vector<8x32xf32>, vector<32x128xf32>, vector<8x128xf32> -> vector<8x128xf32>
      %c0_17 = arith.constant 0 : index
      %c0_18 = arith.constant 0 : index
      %37 = vector.load %arg7[%c0_17, %c0_18] : memref<1x128xf32, #tpu.memory_space<vmem>>, vector<1x128xf32>
      %38 = vector.broadcast %37 : vector<1x128xf32> to vector<8x128xf32>
      %39 = arith.addf %36, %38 : vector<8x128xf32>
      %c0_19 = arith.constant 0 : index
      %c0_20 = arith.constant 0 : index
      %40 = vector.load %arg8[%c0_19, %c0_20] : memref<8x128xf32, #tpu.memory_space<vmem>>, vector<8x128xf32>
      tpu.vector_store %arg8[%c0_19, %c0_20], %39 {strides = array<i32>} : memref<8x128xf32, #tpu.memory_space<vmem>>, vector<8x128xf32>,
    } else {
    }
    return
  }
  func.func @transform_0(%arg0: i32, %arg1: i32, %arg2: memref<8xi32, #tpu.memory_space<smem>>) -> (i32, i32, i32) {
    %c8_i32 = arith.constant 8 : i32
    %0 = arith.muli %arg0, %c8_i32 : i32
    %1 = arith.addi %0, %arg1 : i32
    %c0_i32 = arith.constant 0 : i32
    %c0_i32_0 = arith.constant 0 : i32
    %c0_i32_1 = arith.constant 0 : i32
    return %1, %c0_i32, %c0_i32_0 : i32, i32, i32
  }
  func.func @transform_1(%arg0: i32, %arg1: i32, %arg2: memref<8xi32, #tpu.memory_space<smem>>) -> (i32, i32) {
    %c0_i32 = arith.constant 0 : i32
    %c0_i32_0 = arith.constant 0 : i32
    %c0_i32_1 = arith.constant 0 : i32
    return %c0_i32, %c0_i32_0 : i32, i32
  }
  func.func @transform_2(%arg0: i32, %arg1: i32, %arg2: memref<8xi32, #tpu.memory_space<smem>>) -> (i32, i32) {
    %c0_i32 = arith.constant 0 : i32
    %c0_i32_0 = arith.constant 0 : i32
    %c0_i32_1 = arith.constant 0 : i32
    return %c0_i32, %c0_i32_0 : i32, i32
  }
  func.func @transform_3(%arg0: i32, %arg1: i32, %arg2: memref<8xi32, #tpu.memory_space<smem>>) -> (i32, i32) {
    %c0_i32 = arith.constant 0 : i32
    %c0_i32_0 = arith.constant 0 : i32
    %c0_i32_1 = arith.constant 0 : i32
    return %c0_i32, %c0_i32_0 : i32, i32
  }
  func.func @transform_4(%arg0: i32, %arg1: i32, %arg2: memref<8xi32, #tpu.memory_space<smem>>) -> (i32, i32) {
    %c0_i32 = arith.constant 0 : i32
    %c0_i32_0 = arith.constant 0 : i32
    %c0_i32_1 = arith.constant 0 : i32
    return %c0_i32, %c0_i32_0 : i32, i32
  }
  func.func @transform_5(%arg0: i32, %arg1: i32, %arg2: memref<8xi32, #tpu.memory_space<smem>>) -> (i32, i32) {
    %c0_i32 = arith.constant 0 : i32
    %c0_i32_0 = arith.constant 0 : i32
    return %arg0, %c0_i32 : i32, i32
  }
}

</mosaic_0001>

<bundles_post_ra>
// kernel: tpu_custom_call.1
= control target key start
LH: loop header
LB: loop body
LE: loop exit
PB: predicated region body
PF: predicated region fallthrough
CT: control target
= control target key end

     0   :  { %s830_s24 = smov [#allocation4]   ;;  %s1004_s0 = inlined_call_operand.hbm [shape: s32[8], index: 0, kind: input, shape index: {}]   ;;  %s1005_s1 = inlined_call_operand.hbm [shape: f32[8,8,32], index: 1, kind: input, shape index: {}]   ;;  %s1006_s2 = inlined_call_operand.hbm [shape: f32[32,32], index: 2, kind: input, shape index: {}]   ;;  %s1007_s3 = inlined_call_operand.vmem [shape: f32[1,32], index: 3, kind: input, shape index: {}]   ;;  %s1008_s4 = inlined_call_operand.hbm [shape: f32[32,128], index: 4, kind: input, shape index: {}]   ;;  %s1009_s5 = inlined_call_operand.vmem [shape: f32[1,128], index: 5, kind: input, shape index: {}]   ;;  %s1010_s6 = inlined_call_operand.hbm [shape: f32[8,128], index: 6, kind: output, shape index: {}]  }
   0x1   :  { %s12_s23 = sshll.u32 %s1004_s0, 4  ;;  %s13_s23 = int_to_ptr.hbm [resolvable:$true] %s12_s23 }
   0x2   :  { %15 = dma.hbm_to_smem %s13_s23, 16, %s830_s24, [#allocation3] }
   0x3   :  { %792 = dma.done.wait [#allocation3], 16 }
   0x4   :  { %793 = vsyncadd [#allocation3], 4294967280 }
   0x5   :  { %18 = sfence }
   0x6   :  { %19 = vsyncpa [#allocation6], 0 }
   0x7   :  { %21 = vsyncpa [#allocation6 + $0x1], 0 }
   0x8   :  { %22 = vsyncpa [#allocation9], 0 }
   0x9   :  { %23 = vsyncpa [#allocation7], 0  ;;  %s874_s25 = smov 0   ;;  %s876_s26 = smov 0  }
   0xa   :  { %s878_s27 = smov 0   ;;  %s880_s28 = smov 0  }
   0xb   :  { %s882_s29 = smov 0   ;;  %s884_s0 = smov 0  }
   0xc LB: > { %s1011_s30 = sadd.s32 4294967295, %s828_s0   ;;  %p521_p0 = scmp.ge.s32.totalorder %s828_s0, 1  ;;  %s828_s0 = sphi %s884_s0, %s29_s0   ;;  %s824_s29 = sphi %s882_s29, %s1021_s29   ;;  %s820_s28 = sphi %s880_s28, %s1020_s28   ;;  %s816_s27 = sphi %s878_s27, %s1019_s27   ;;  %s812_s26 = sphi %s876_s26, %s1018_s26   ;;  %s808_s25 = sphi %s874_s25, %s1017_s25  }
   0xd   : > { %p908_p1 = scmp.eq.s32.totalorder %s1011_s30, 0  ;;  %p186_p2 = scmp.lt.s32.totalorder %s828_s0, 9 }
   0xe   : > { %s197_s10 = sshll.u32 %s1006_s2, 4  ;;  %s831_s12 = smov [#allocation8]   ;;  %s198_s10 = int_to_ptr.hbm [resolvable:$true] %s197_s10 }
   0xf   : > { %p916_p3 = pnand %p521_p0, %p186_p2  ;;  %s199_s13 = sshll.u32 %s831_s12, 4  ;;  %s200_s13 = int_to_ptr.vmem [resolvable:$true] %s199_s13 }
  0x10   : > { %s214_s16 = sshll.u32 %s1008_s4, 4  ;;  %s832_s17 = smov 128   ;;  %s215_s16 = int_to_ptr.hbm [resolvable:$true] %s214_s16 }
  0x11   : > { %p560_p4 = pneg %p916_p3  ;;  %s833_s18 = smov 8  }
  0x12   : > { %s834_s19 = smov [#allocation10]   ;;  %s38_s21 = sadd.s32 1, %s824_s29 }
  0x13   : > { %p561_p5 = pnand %p560_p4, %p908_p1  ;;  %s216_s20 = sshll.u32 %s834_s19, 4  ;;  %s217_s20 = int_to_ptr.vmem [resolvable:$true] %s216_s20 }
  0x14   : > { %s52_s22 = sadd.s32 1, %s816_s27  ;;  %p39_p6 = scmp.ge.s32.totalorder %s38_s21, 8 }
  0x15   : > { %563 = dma.hbm_to_vmem [thread:$0]  (!%p561_p5), %s198_s10, 512, %s200_s13, [#allocation9], %s832_s17, %s832_s17, %s833_s18  }
  0x16   : > { %566 = dma.hbm_to_vmem [thread:$0]  (!%p561_p5), %s215_s16, 512, %s217_s20, [#allocation9], %s832_s17, %s832_s17, %s833_s18  }
  0x17   : > { %p59_p7 = scmp.ne.s32.totalorder %s816_s27, %s812_s26  ;;  %p60_p8 = scmp.eq.s32.totalorder %s828_s0, 0 }
  0x18   : > { %p65_p9 = scmp.ne.s32.totalorder %s812_s26, %s808_s25  ;;  %s1023_s21 = smov (%p39_p6, %s38_s21), 0 }
  0x19   : > { %p936_p10 = por %p60_p8, %p59_p7  ;;  %s49_s8 = ssub.s32 %s824_s29, %s1023_s21 }
  0x1a   : > { %p942_p11 = por %p908_p1, %p65_p9  ;;  %p573_p12 = scmp.lt.s32.totalorder %s828_s0, 8 }
  0x1b   : > { %p50_p13 = scmp.eq.s32.totalorder %s49_s8, 0  ;;  %s233_s9 = sand.u32 1, %s816_s27  }
  0x1c   : > { %s525_s10 = sshll.u32 %s233_s9, 3  ;;  %s526_s25 = sshll.u32 %s824_s29, 3 }
  0x1d   : > { %s951_s12 = scalar_select %p50_p13, %s816_s27, %s52_s22  }
  0x1e   : > { %s243_s15 = scalar_lea.hbm %s1005_s1, %s526_s25  ;;  %s237_s16 = scalar_lea.vmem [#allocation5], %s525_s10 }
  0x1f   : > { %s247_s17 = sshll.u32 %s237_s16, 4  ;;  %s245_s18 = sshll.u32 %s243_s15, 4  ;;  %s248_s17 = int_to_ptr.vmem [resolvable:$true] %s247_s17  ;;  %s246_s18 = int_to_ptr.hbm [resolvable:$true] %s245_s18 }
  0x20   : > { %p568_p0 = pnand %p573_p12, %p936_p10  ;;  %s234_s19 = scalar_lea.sflag [#allocation6], %s233_s9 }
  0x21   : > { %256 = sbr.rel (%p916_p3) target bundleno = 478 (0x1de), region = 40  ;;  %s258_s20 = sand.u32 (!%p916_p3), 1, %s812_s26  }
  0x22   : > { %570 = dma.hbm_to_vmem [thread:$0]  (!%p568_p0), %s246_s18, 128, %s248_s17, %s234_s19  }
  0x23   : > { %s528_s22 = sshll.u32 (!%p916_p3), %s258_s20, 3  ;;  %s259_s8 = scalar_lea.sflag (!%p916_p3), [#allocation6], %s258_s20 }
  0x24   : > { %s262_s30 = scalar_lea.vmem (!%p916_p3), [#allocation5], %s528_s22 }
  0x26   : > { %795 = dma.done.wait (%p942_p11), %s259_s8, 128  }
  0x27   : > { %797 = vsyncadd (%p942_p11), %s259_s8, 4294967168 }
  0x28   : > { %799 = dma.done.wait (%p908_p1), [#allocation9], 1024  }
  0x29   : > { %801 = vsyncadd (%p908_p1), [#allocation9], 4294966272  ;;  %s299_s11 = sld [smem:[#allocation4 + %s820_s28]]  ;;  %v328_v0 = vld [vmem:[%s262_s30] sm:$0xff]  ;;  %v321_v2 = vlaneseq  ;;  %vm329_vm7 = vcmask 64512   ;;  %vm354_vm8 = vcmask 253952  }
  0x2a   : > { %348 = vmatpush.msra.mxu0 %v328_v0  ;;  %s353_s30 = scalar_lea.vmem [#allocation2], %s820_s28  ;;  %p537_p1 = scmp.ne.s32.totalorder %s820_s28, 7 }
  0x2b   : > { %v322_v5 = vand.u32 127, %v321_v2 }
  0x2d   : > { %vm323_vm2 = vcmp.ge.s32.totalorder %v322_v5, 1 }
  0x2f   : > { %p300_p2 = scmp.lt.s32.totalorder %s299_s11, 7  ;;  %p531_p3 = scmp.gt.s32.totalorder %s299_s11, 1  ;;  %v324_v7 = vstv %s299_s11 }
  0x30   : > { %vm325_vm3 = vcmp.le.s32.totalorder %v322_v5, %v324_v7 }
  0x31   : > { %s301_s23 = scalar_select %p300_p2, %s299_s11, 7  ;;  %vm326_vm6 = vmand %vm323_vm2, %vm325_vm3 }
  0x33   : > { %s1025_s23 = smov (!%p531_p3, %s301_s23), 1 }
  0x34   : > { %s304_s9 = scvt.s32.f32 %s1025_s23 }
  0x36   : > { %v305_v1 = vstv %s304_s9 }
  0x37   : > { %632 = vrcp.f32 %v305_v1  ;;  %v317_v6 = vand.u32 2147483648, %v305_v1  ;;  %vm311_vm0 = vweird.f32 %v305_v1  ;;  %v315_v9 = vand.u32 2147483647, %v305_v1 }
  0x39   : > { %v318_v11 = vor.u32 1.1754944e-38, %v317_v6  ;;  %vm316_vm5 = vcmp.eq.f32.partialorder %v315_v9, 8.507059e+37 }
  0x3d   : > { %v633_v3 = vpop.eup %632 }
  0x3e   : > { %v307_v4 = vmul.f32 %v633_v3, %v305_v1  ;;  %vm312_vm1 = vweird.f32 %v633_v3 }
  0x3f   : > { %vm313_vm4 = vmor %vm311_vm0, %vm312_vm1 }
  0x40   : > { %v308_v8 = vsub.f32 1.0, %v307_v4 }
  0x42   : > { %v309_v10 = vmul.f32 %v633_v3, %v308_v8 }
  0x44   : > { %v310_v12 = vadd.f32 %v633_v3, %v309_v10 }
  0x46   : > { %v314_v13 = vsel %vm313_vm4, %v633_v3, %v310_v12 }
  0x47   : > { %v319_v14 = vsel %vm316_vm5, %v318_v11, %v314_v13 }
  0x48   : > { %v327_v15 = vsel %vm326_vm6, %v319_v14, 0.0 }
  0x49   : > { %536 = vmatmul.msk.f32.vlgmr.msra.gmra.mxu0 %vm329_vm7, %v327_v15 }
  0xc3   : > { %359 = sbr.rel (%p537_p1) target bundleno = 472 (0x1d8), region = 56 }
  0xc6   : > { %v350_v16 = vpop.f32.mrf.mxu0 }
  0xc7   : > { %355 = vst.msk [vmem:[%s353_s30] sm:$0x1] %vm354_vm8, %v350_v16 }
  0xc8   : > { %v364_v17 = vld [vmem:[#allocation8 + $0x18] sm:$0xff]  ;;  %v363_v18 = vld [vmem:[#allocation8 + $0x10] sm:$0xff]  ;;  %v362_v19 = vld [vmem:[#allocation8 + $0x8] sm:$0xff]  ;;  %vm369_vm9 = vcmask 261120  }
  0xc9   : > { %385 = vmatpush.msra.mxu0 %v364_v17  ;;  %v361_v20 = vld [vmem:[#allocation8] sm:$0xff]  ;;  %v397_v22 = vld [vmem:[#allocation10 + $0x18] sm:$0xff]  ;;  %v396_v23 = vld [vmem:[#allocation10 + $0x10] sm:$0xff] }
  0xca   : > { %417 = vmatpush.msra.mxu1 %v397_v22  ;;  %v395_v24 = vld [vmem:[#allocation10 + $0x8] sm:$0xff]  ;;  %v394_v25 = vld [vmem:[#allocation10] sm:$0xff] }
  0xcb   : > { %386 = vmatpush.msra.mxu0 %v363_v18  ;;  %v634_v26 = vld [vmem:[%s1007_s3] ss:$0 sm:$0xff] }
  0xcc   : > { %418 = vmatpush.msra.mxu1 %v396_v23  ;;  %v635_v30 = vld [vmem:[%s1009_s5] ss:$0 sm:$0xff] }
  0xcd   : > { %387 = vmatpush.msra.mxu0 %v362_v19 }
  0xce   : > { %v360_v21 = vld [vmem:[#allocation2] sm:$0xff]  ;;  %419 = vmatpush.msra.mxu1 %v395_v24 }
  0xcf   : > { %388 = vmatpush.msra.mxu0 %v361_v20 }
  0xd0   : > { %538 = vmatmul.msk.f32.vlgmr.msra.gmra.mxu0 %vm369_vm9, %v360_v21  ;;  %420 = vmatpush.msra.mxu1 %v394_v25 }
 0x14d   : > { %v390_v27 = vpop.f32.mrf.mxu0 }
 0x14e   : > { %v391_v28 = vadd.f32 %v634_v26, %v390_v27 }
 0x150   : > { %636 = vtanh.f32 %v391_v28 }
 0x156   : > { %v637_v29 = vpop.eup %636 }
 0x157   : > { %539 = vmatmul.msk.f32.vlgmr.msra.gmra.mxu1 %vm369_vm9, %v637_v29 }
 0x1d4   : > { %v422_v31 = vpop.f32.mrf.mxu1 }
 0x1d5   : > { %v423_v32 = vadd.f32 %v635_v30, %v422_v31 }
 0x1d7   : > { %425 = vst [vmem:[#allocation11] sm:$0xff] %v423_v32 }
 0x1d8 PF: > { %s1016_s25 = sadd.s32 4294967295, %s828_s0   ;;  %s436_s15 = sshll.u32 %s1010_s6, 4  ;;  %s437_s15 = int_to_ptr.hbm [resolvable:$true] %s436_s15 }
 0x1d9   : > { %p576_p4 = scmp.eq.s32.totalorder %s1016_s25, 7  ;;  %s835_s16 = smov [#allocation11]  }
 0x1da   : > { %s434_s17 = sshll.u32 %s835_s16, 4  ;;  %s435_s17 = int_to_ptr.vmem [resolvable:$true] %s434_s17 }
 0x1db   : > { %557 = dma.vmem_to_hbm [thread:$0]  (%p576_p4), %s435_s17, 128, %s437_s15, [#allocation7]  }
 0x1dc   : > { %803 = dma.done.wait (%p576_p4), [#allocation7], 128  }
 0x1dd   : > { %805 = vsyncadd (%p576_p4), [#allocation7], 4294967168 }
 0x1de PF: > { %s29_s0 = sadd.s32 1, %s828_s0   ;;  %s1017_s25 = smov %s812_s26 }
 0x1df   : > { %p26_p5 = scmp.ge.s32.totalorder %s29_s0, 10   ;;  %s1018_s26 = smov %s816_s27 }
 0x1e0   : > { %s1019_s27 = smov %s951_s12  ;;  %s1020_s28 = smov %s824_s29 }
 0x1e1   : > { %s1021_s29 = smov %s1023_s21  ;;  %28 = sbr.rel (!%p26_p5) target bundleno = 12 (0xc), region = 91 }
 0x1e6   :  { %450 = vsyncpa [#allocation6], 1 }
 0x1e7   :  { %452 = vsyncpa [#allocation6 + $0x1], 1 }
 0x1e8   :  { %453 = vsyncpa [#allocation9], 1 }
 0x1e9   :  { %454 = vsyncpa [#allocation7], 1 }
 0x1ea   :  { %456 = vsyncpa [#allocation7 + $0x1], 1 }

</bundles_post_ra>
